<compile_context>
chip_gen: v5e
topology: v5e:2x2
jax: 0.10.0
libtpu: 0.0.40
codegen_flags: <defaults>
</compile_context>

<pallas_src>
import jax
import jax.numpy as jnp
from jax.experimental import pallas as pl
from jax.experimental.pallas import tpu as pltpu

_LANE = 128
_SMALL_INPUT_BYTES = 512 * 1024  # <= 0.5 MiB total -> plain XLA path


def _round_up(x: int, m: int) -> int:
    return ((x + m - 1) // m) * m


def _sublane_pack(itemsize: int) -> int:
    # Native vreg sublane packing: f32 -> 8, bf16/f16 -> 16, int8/fp8 -> 32.
    return max(8, 32 // max(1, itemsize))


def _chip_params():
    """Returns (num_tensorcores, per-step VMEM budget bytes), generation-aware."""
    kind = ""
    try:
        kind = jax.devices()[0].device_kind.lower()
    except Exception:
        pass
    if "v7" in kind:
        # 2 TCs share the chip; 64 MiB physical / 32 MiB default scoped VMEM.
        return 2, 24 * 1024 * 1024
    if "v6" in kind:
        # 1 TC; 128 MiB physical / 32 MiB default scoped VMEM.
        return 1, 24 * 1024 * 1024
    # v5e and unknown chips: 16 MiB default scoped VMEM -> stay conservative.
    return 1, 12 * 1024 * 1024


# ----------------------------------------------------------------------------
# Kernels
# ----------------------------------------------------------------------------
def _make_fold_kernel(num_channels: int):
    inv_c = 1.0 / float(num_channels)

    def kernel(x_ref, o_ref):
        # x_ref: (C, TR, L) sublane/lane-dense slabs; o_ref: (TR, L).
        # Unrolled channel adds on the VPU over full dense slabs.
        acc = x_ref[0].astype(jnp.float32)
        for c in range(1, num_channels):
            acc = acc + x_ref[c].astype(jnp.float32)
        o_ref[...] = (acc * inv_c).astype(o_ref.dtype)

    return kernel


def _make_row_kernel(num_channels: int):
    inv_c = 1.0 / float(num_channels)

    def kernel(x_ref, o_ref):
        # x_ref: (C, TILE); o_ref: (1, TILE). Sublane-sparse fallback (ragged N).
        acc = x_ref[0:1, :].astype(jnp.float32)
        for c in range(1, num_channels):
            acc = acc + x_ref[c:c + 1, :].astype(jnp.float32)
        o_ref[...] = (acc * inv_c).astype(o_ref.dtype)

    return kernel


# ----------------------------------------------------------------------------
# Dense (sublane-folded) path: N % L == 0, L a multiple of 128.
# ----------------------------------------------------------------------------
def _stereo2mono_dense(x: jnp.ndarray, lane_fold: int) -> jnp.ndarray:
    C, N = x.shape
    itemsize = jnp.dtype(x.dtype).itemsize
    pack = _sublane_pack(itemsize)
    num_cores, vmem_budget = _chip_params()

    L = lane_fold
    R = N // L
    xf = x.reshape(C, R, L)  # free: contiguous row-major reshape

    # Double-buffered footprint per step: 2 * (C input + 1 output) * TR * L.
    # Blocks are sublane/lane-dense, so nominal == actual (no hidden padding).
    tr = vmem_budget // (2 * (C + 1) * L * itemsize)
    tr = max(pack, (tr // pack) * pack)
    if num_cores > 1:
        # Keep >= num_cores grid steps so "parallel" can shard across TCs (v7x).
        tr = min(tr, max(pack, _round_up(pl.cdiv(R, num_cores), pack)))
    if tr >= R:
        tr = R  # single block on the row axis (equals full dim -> always legal)
    grid = (pl.cdiv(R, tr),)

    cost = pl.CostEstimate(
        flops=C * N,
        transcendentals=0,
        bytes_accessed=(C + 1) * N * itemsize,
    )

    out = pl.pallas_call(
        _make_fold_kernel(C),
        out_shape=jax.ShapeDtypeStruct((R, L), x.dtype),
        grid_spec=pltpu.PrefetchScalarGridSpec(
            num_scalar_prefetch=0,
            grid=grid,
            in_specs=[pl.BlockSpec((C, tr, L), lambda i: (0, i, 0))],
            out_specs=pl.BlockSpec((tr, L), lambda i: (i, 0)),
        ),
        compiler_params=pltpu.CompilerParams(
            dimension_semantics=("parallel",),
        ),
        cost_estimate=cost,
    )(xf)
    return out.reshape(1, N)  # free: contiguous


# ----------------------------------------------------------------------------
# Ragged fallback path: N not a multiple of 128 (sublane-sparse but correct).
# ----------------------------------------------------------------------------
def _stereo2mono_rows(x: jnp.ndarray) -> jnp.ndarray:
    C, N = x.shape
    itemsize = jnp.dtype(x.dtype).itemsize
    pack = _sublane_pack(itemsize)
    num_cores, vmem_budget = _chip_params()

    # Padding-aware accounting: the (C, tile) input block pads its sublane dim
    # to ceil(C/pack)*pack rows and the (1, tile) output block pads to `pack`.
    padded_rows = _round_up(C, pack) + pack
    tile = vmem_budget // (2 * padded_rows * itemsize)
    tile = max(_LANE, (tile // _LANE) * _LANE)
    if num_cores > 1:
        tile = min(tile, max(_LANE, _round_up(pl.cdiv(N, num_cores), _LANE)))
    tile = min(tile, _round_up(N, _LANE))
    grid = (pl.cdiv(N, tile),)

    cost = pl.CostEstimate(
        flops=C * N,
        transcendentals=0,
        bytes_accessed=(C + 1) * N * itemsize,
    )

    out = pl.pallas_call(
        _make_row_kernel(C),
        out_shape=jax.ShapeDtypeStruct((1, N), x.dtype),
        grid_spec=pltpu.PrefetchScalarGridSpec(
            num_scalar_prefetch=0,
            grid=grid,
            in_specs=[pl.BlockSpec((C, tile), lambda i: (0, i))],
            out_specs=pl.BlockSpec((1, tile), lambda i: (0, i)),
        ),
        compiler_params=pltpu.CompilerParams(
            dimension_semantics=("parallel",),
        ),
        cost_estimate=cost,
    )(x)
    return out


# ----------------------------------------------------------------------------
# Public wrapper (matches Stereo2Mono.forward semantics).
# ----------------------------------------------------------------------------
def stereo2mono(x: jnp.ndarray) -> jnp.ndarray:
    """JAX/Pallas equivalent of Stereo2Mono.forward for (C, N) inputs."""
    C, N = x.shape
    if C == 1:
        return x

    itemsize = jnp.dtype(x.dtype).itemsize
    if C * N * itemsize <= _SMALL_INPUT_BYTES:
        # pallas_call launch + pipeline warm-up exceeds the whole transfer here.
        return jnp.mean(x.astype(jnp.float32), axis=0, keepdims=True).astype(x.dtype)

    # Prefer the sublane-dense fold with the largest lane chunk that divides N.
    for L in (1024, 512, 256, 128):
        if N % L == 0:
            return _stereo2mono_dense(x, L)
    # Ragged N: sublane-sparse but correct fallback.
    return _stereo2mono_rows(x)


if __name__ == "__main__":
    key = jax.random.PRNGKey(0)
    k1, k2, k3, k4, k5 = jax.random.split(key, 5)

    def ref_mean(a):
        return jnp.mean(a.astype(jnp.float32), axis=0, keepdims=True).astype(a.dtype)

    # Stereo f32, lane-foldable N: dense (C, R, L) Pallas path.
    x = jax.random.normal(k1, (2, 131072), dtype=jnp.float32)
    y = jax.block_until_ready(stereo2mono(x))
    assert y.shape == (1, 131072), y.shape
    assert jnp.allclose(y, ref_mean(x), atol=1e-6, rtol=1e-6)

    # Ragged sample count (not a multiple of 128): sublane-sparse fallback path.
    x_r = jax.random.normal(k2, (2, 100000), dtype=jnp.float32)
    y_r = jax.block_until_ready(stereo2mono(x_r))
    assert y_r.shape == (1, 100000), y_r.shape
    assert jnp.allclose(y_r, ref_mean(x_r), atol=1e-6, rtol=1e-6)

    # More than two channels (C > 2), dense path.
    x4 = jax.random.normal(k3, (4, 131072), dtype=jnp.float32)
    y4 = jax.block_until_ready(stereo2mono(x4))
    assert y4.shape == (1, 131072), y4.shape
    assert jnp.allclose(y4, ref_mean(x4), atol=1e-5, rtol=1e-5)

    # bf16 stereo, dense path with sublane pack 16.
    x_b = jax.random.normal(k5, (2, 262144), dtype=jnp.bfloat16)
    y_b = jax.block_until_ready(stereo2mono(x_b))
    assert y_b.shape == (1, 262144) and y_b.dtype == jnp.bfloat16
    assert jnp.allclose(y_b.astype(jnp.float32), ref_mean(x_b).astype(jnp.float32),
                        atol=1e-2, rtol=1e-2)

    # Mono pass-through (C == 1): returned unchanged.
    x_m = jax.random.normal(k4, (1, 1024), dtype=jnp.float32)
    y_m = jax.block_until_ready(stereo2mono(x_m))
    assert y_m.shape == (1, 1024)
    assert jnp.array_equal(y_m, x_m)

    # Tiny stereo buffer: XLA fallback path (below the Pallas threshold).
    x_s = jax.random.normal(k1, (2, 1024), dtype=jnp.float32)
    y_s = jax.block_until_ready(stereo2mono(x_s))
    assert jnp.allclose(y_s, ref_mean(x_s), atol=1e-6, rtol=1e-6)

    print("KERNEL_OK")
</pallas_src>

<mosaic_0001>
module attributes {stable_mosaic.version = 11 : i64} {
  func.func @kernel(%arg0: i32, %arg1: memref<2x128x1024xf32, #tpu.memory_space<vmem>>, %arg2: memref<128x1024xf32, #tpu.memory_space<vmem>>) attributes {dimension_semantics = [#tpu.dimension_semantics<parallel>], iteration_bounds = array<i64: 1>, scalar_prefetch = 0 : i64, scratch_operands = 0 : i64, tpu.core_type = #tpu.core_type<tc>, window_params = [{transform_indices = @transform_0, window_bounds = array<i64: 2, 128, 1024>}, {transform_indices = @transform_1, window_bounds = array<i64: 128, 1024>}]} {
    %c0 = arith.constant 0 : index
    %c0_0 = arith.constant 0 : index
    %c0_1 = arith.constant 0 : index
    %0 = vector.load %arg1[%c0, %c0_0, %c0_1] : memref<2x128x1024xf32, #tpu.memory_space<vmem>>, vector<1x128x1024xf32>
    %1 = vector.shape_cast %0 : vector<1x128x1024xf32> to vector<128x1024xf32>
    %c1 = arith.constant 1 : index
    %c0_2 = arith.constant 0 : index
    %c0_3 = arith.constant 0 : index
    %2 = vector.load %arg1[%c1, %c0_2, %c0_3] : memref<2x128x1024xf32, #tpu.memory_space<vmem>>, vector<1x128x1024xf32>
    %3 = vector.shape_cast %2 : vector<1x128x1024xf32> to vector<128x1024xf32>
    %4 = arith.addf %1, %3 : vector<128x1024xf32>
    %cst = arith.constant 5.000000e-01 : f32
    %5 = vector.broadcast %cst : f32 to vector<128x1024xf32>
    %6 = arith.mulf %4, %5 : vector<128x1024xf32>
    %c0_4 = arith.constant 0 : index
    %c0_5 = arith.constant 0 : index
    %7 = vector.load %arg2[%c0_4, %c0_5] : memref<128x1024xf32, #tpu.memory_space<vmem>>, vector<128x1024xf32>
    tpu.vector_store %arg2[%c0_4, %c0_5], %6 {strides = array<i32>} : memref<128x1024xf32, #tpu.memory_space<vmem>>, vector<128x1024xf32>,
    return
  }
  func.func @transform_0(%arg0: i32) -> (i32, i32, i32) {
    %c0_i32 = arith.constant 0 : i32
    %c0_i32_0 = arith.constant 0 : i32
    %c0_i32_1 = arith.constant 0 : i32
    return %c0_i32, %arg0, %c0_i32_0 : i32, i32, i32
  }
  func.func @transform_1(%arg0: i32) -> (i32, i32) {
    %c0_i32 = arith.constant 0 : i32
    %c0_i32_0 = arith.constant 0 : i32
    return %arg0, %c0_i32 : i32, i32
  }
}

</mosaic_0001>

<bundles_post_ra>
// kernel: tpu_custom_call.1
= control target key start
LH: loop header
LB: loop body
LE: loop exit
PB: predicated region body
PF: predicated region fallthrough
CT: control target
= control target key end

     0   :  { %6 = vsyncpa [#allocation3], 0  ;;  %s767_s0 = inlined_call_operand.hbm [shape: f32[2,128,1024], index: 0, kind: input, shape index: {}]   ;;  %s768_s1 = inlined_call_operand.hbm [shape: f32[128,1024], index: 1, kind: output, shape index: {}]  }
   0x1   :  { %7 = vsyncpa [#allocation4], 0  ;;  %s12_s8 = sshll.u32 %s767_s0, 4  ;;  %s741_s9 = smov [#allocation2]   ;;  %s13_s8 = int_to_ptr.hbm [resolvable:$true] %s12_s8 }
   0x2   :  { %s14_s10 = sshll.u32 %s741_s9, 4  ;;  %s742_s11 = smov 1024   ;;  %s15_s10 = int_to_ptr.vmem [resolvable:$true] %s14_s10 }
   0x3   :  { %s743_s12 = smov 64  }
   0x4   :  { %20 = dma.hbm_to_vmem [thread:$0]  %s13_s8, 32768, %s15_s10, [#allocation3], %s742_s11, %s742_s11, %s743_s12  }
   0x5   :  { %737 = dma.done.wait [#allocation3], 32768  }
   0x6   :  { %738 = vsyncadd [#allocation3], 4294934528  ;;  %v25_v0 = vld [vmem:[#allocation2] sm:$0xff]  ;;  %v26_v2 = vld [vmem:[#allocation2 + $0x8] sm:$0xff]  ;;  %s744_s0 = smov [#allocation5]   ;;  %s672_s16 = sshll.u32 %s768_s1, 4  ;;  %s673_s16 = int_to_ptr.hbm [resolvable:$true] %s672_s16 }
   0x7   :  { %v154_v1 = vld [vmem:[#allocation2 + $0x400] sm:$0xff]  ;;  %v155_v4 = vld [vmem:[#allocation2 + $0x408] sm:$0xff]  ;;  %v27_v5 = vld [vmem:[#allocation2 + $0x10] sm:$0xff]  ;;  %s670_s13 = sshll.u32 %s744_s0, 4  ;;  %s671_s13 = int_to_ptr.vmem [resolvable:$true] %s670_s13 }
   0x8   :  { %v282_v3 = vadd.f32 %v154_v1, %v25_v0  ;;  %v156_v6 = vld [vmem:[#allocation2 + $0x410] sm:$0xff]  ;;  %v283_v7 = vadd.f32 %v155_v4, %v26_v2  ;;  %v28_v9 = vld [vmem:[#allocation2 + $0x18] sm:$0xff]  ;;  %v29_v11 = vld [vmem:[#allocation2 + $0x20] sm:$0xff] }
   0x9   :  { %v284_v8 = vadd.f32 %v156_v6, %v27_v5  ;;  %v157_v10 = vld [vmem:[#allocation2 + $0x418] sm:$0xff]  ;;  %v158_v14 = vld [vmem:[#allocation2 + $0x420] sm:$0xff]  ;;  %v30_v15 = vld [vmem:[#allocation2 + $0x28] sm:$0xff] }
   0xa   :  { %v410_v12 = vmul.f32 0.5, %v282_v3  ;;  %v285_v13 = vadd.f32 %v157_v10, %v28_v9  ;;  %v159_v16 = vld [vmem:[#allocation2 + $0x428] sm:$0xff]  ;;  %v411_v17 = vmul.f32 0.5, %v283_v7  ;;  %v286_v19 = vadd.f32 %v158_v14, %v29_v11  ;;  %v31_v21 = vld [vmem:[#allocation2 + $0x30] sm:$0xff]  ;;  %v32_v23 = vld [vmem:[#allocation2 + $0x38] sm:$0xff] }
   0xb   :  { %v412_v18 = vmul.f32 0.5, %v284_v8  ;;  %v287_v20 = vadd.f32 %v159_v16, %v30_v15  ;;  %v160_v22 = vld [vmem:[#allocation2 + $0x430] sm:$0xff]  ;;  %v161_v26 = vld [vmem:[#allocation2 + $0x438] sm:$0xff]  ;;  %v33_v27 = vld [vmem:[#allocation2 + $0x40] sm:$0xff] }
   0xc   :  { %538 = vst [vmem:[#allocation5] sm:$0xff] %v410_v12  ;;  %v413_v24 = vmul.f32 0.5, %v285_v13  ;;  %v288_v25 = vadd.f32 %v160_v22, %v31_v21  ;;  %v162_v28 = vld [vmem:[#allocation2 + $0x440] sm:$0xff]  ;;  %v414_v29 = vmul.f32 0.5, %v286_v19  ;;  %v289_v31 = vadd.f32 %v161_v26, %v32_v23  ;;  %v34_v33 = vld [vmem:[#allocation2 + $0x48] sm:$0xff]  ;;  %v35_v35 = vld [vmem:[#allocation2 + $0x50] sm:$0xff] }
   0xd   :  { %539 = vst [vmem:[#allocation5 + $0x8] sm:$0xff] %v411_v17  ;;  %v415_v30 = vmul.f32 0.5, %v287_v20  ;;  %v290_v32 = vadd.f32 %v162_v28, %v33_v27  ;;  %v163_v34 = vld [vmem:[#allocation2 + $0x448] sm:$0xff]  ;;  %v164_v38 = vld [vmem:[#allocation2 + $0x450] sm:$0xff]  ;;  %v36_v39 = vld [vmem:[#allocation2 + $0x58] sm:$0xff] }
   0xe   :  { %540 = vst [vmem:[#allocation5 + $0x10] sm:$0xff] %v412_v18  ;;  %v416_v36 = vmul.f32 0.5, %v288_v25  ;;  %v291_v37 = vadd.f32 %v163_v34, %v34_v33  ;;  %v165_v40 = vld [vmem:[#allocation2 + $0x458] sm:$0xff]  ;;  %v417_v41 = vmul.f32 0.5, %v289_v31  ;;  %v292_v42 = vadd.f32 %v164_v38, %v35_v35  ;;  %v37_v44 = vld [vmem:[#allocation2 + $0x60] sm:$0xff]  ;;  %v38_v46 = vld [vmem:[#allocation2 + $0x68] sm:$0xff] }
   0xf   :  { %541 = vst [vmem:[#allocation5 + $0x18] sm:$0xff] %v413_v24  ;;  %v293_v43 = vadd.f32 %v165_v40, %v36_v39  ;;  %v166_v45 = vld [vmem:[#allocation2 + $0x460] sm:$0xff]  ;;  %v418_v47 = vmul.f32 0.5, %v290_v32  ;;  %v167_v49 = vld [vmem:[#allocation2 + $0x468] sm:$0xff]  ;;  %v39_v50 = vld [vmem:[#allocation2 + $0x70] sm:$0xff] }
  0x10   :  { %542 = vst [vmem:[#allocation5 + $0x20] sm:$0xff] %v414_v29  ;;  %v294_v48 = vadd.f32 %v166_v45, %v37_v44  ;;  %v168_v51 = vld [vmem:[#allocation2 + $0x470] sm:$0xff]  ;;  %v419_v52 = vmul.f32 0.5, %v291_v37  ;;  %v295_v53 = vadd.f32 %v167_v49, %v38_v46  ;;  %v40_v54 = vld [vmem:[#allocation2 + $0x78] sm:$0xff]  ;;  %v41_v56 = vld [vmem:[#allocation2 + $0x80] sm:$0xff]  ;;  %v420_v57 = vmul.f32 0.5, %v292_v42 }
  0x11   :  { %543 = vst [vmem:[#allocation5 + $0x28] sm:$0xff] %v415_v30  ;;  %v169_v55 = vld [vmem:[#allocation2 + $0x478] sm:$0xff]  ;;  %v296_v58 = vadd.f32 %v168_v51, %v39_v50  ;;  %v170_v59 = vld [vmem:[#allocation2 + $0x480] sm:$0xff]  ;;  %v42_v60 = vld [vmem:[#allocation2 + $0x88] sm:$0xff]  ;;  %v421_v62 = vmul.f32 0.5, %v293_v43 }
  0x12   :  { %544 = vst [vmem:[#allocation5 + $0x30] sm:$0xff] %v416_v36  ;;  %v171_v61 = vld [vmem:[#allocation2 + $0x488] sm:$0xff]  ;;  %v297_v63 = vadd.f32 %v169_v55, %v40_v54  ;;  %v43_v0 = vld [vmem:[#allocation2 + $0x90] sm:$0xff]  ;;  %v422_v2 = vmul.f32 0.5, %v294_v48  ;;  %v298_v3 = vadd.f32 %v170_v59, %v41_v56  ;;  %v44_v4 = vld [vmem:[#allocation2 + $0x98] sm:$0xff]  ;;  %v423_v6 = vmul.f32 0.5, %v295_v53 }
  0x13   :  { %545 = vst [vmem:[#allocation5 + $0x38] sm:$0xff] %v417_v41  ;;  %v172_v1 = vld [vmem:[#allocation2 + $0x490] sm:$0xff]  ;;  %v173_v5 = vld [vmem:[#allocation2 + $0x498] sm:$0xff]  ;;  %v299_v7 = vadd.f32 %v171_v61, %v42_v60  ;;  %v45_v8 = vld [vmem:[#allocation2 + $0xa0] sm:$0xff]  ;;  %v424_v10 = vmul.f32 0.5, %v296_v58 }
  0x14   :  { %546 = vst [vmem:[#allocation5 + $0x40] sm:$0xff] %v418_v47  ;;  %v174_v9 = vld [vmem:[#allocation2 + $0x4a0] sm:$0xff]  ;;  %v300_v11 = vadd.f32 %v172_v1, %v43_v0  ;;  %v46_v12 = vld [vmem:[#allocation2 + $0xa8] sm:$0xff]  ;;  %v425_v14 = vmul.f32 0.5, %v297_v63  ;;  %v301_v15 = vadd.f32 %v173_v5, %v44_v4  ;;  %v47_v16 = vld [vmem:[#allocation2 + $0xb0] sm:$0xff]  ;;  %v426_v18 = vmul.f32 0.5, %v298_v3 }
  0x15   :  { %547 = vst [vmem:[#allocation5 + $0x48] sm:$0xff] %v419_v52  ;;  %v175_v13 = vld [vmem:[#allocation2 + $0x4a8] sm:$0xff]  ;;  %v176_v17 = vld [vmem:[#allocation2 + $0x4b0] sm:$0xff]  ;;  %v302_v19 = vadd.f32 %v174_v9, %v45_v8  ;;  %v48_v20 = vld [vmem:[#allocation2 + $0xb8] sm:$0xff]  ;;  %v427_v22 = vmul.f32 0.5, %v299_v7 }
  0x16   :  { %548 = vst [vmem:[#allocation5 + $0x50] sm:$0xff] %v420_v57  ;;  %v177_v21 = vld [vmem:[#allocation2 + $0x4b8] sm:$0xff]  ;;  %v303_v23 = vadd.f32 %v175_v13, %v46_v12  ;;  %v49_v24 = vld [vmem:[#allocation2 + $0xc0] sm:$0xff]  ;;  %v428_v26 = vmul.f32 0.5, %v300_v11  ;;  %v304_v27 = vadd.f32 %v176_v17, %v47_v16  ;;  %v50_v28 = vld [vmem:[#allocation2 + $0xc8] sm:$0xff]  ;;  %v429_v30 = vmul.f32 0.5, %v301_v15 }
  0x17   :  { %549 = vst [vmem:[#allocation5 + $0x58] sm:$0xff] %v421_v62  ;;  %v178_v25 = vld [vmem:[#allocation2 + $0x4c0] sm:$0xff]  ;;  %v179_v29 = vld [vmem:[#allocation2 + $0x4c8] sm:$0xff]  ;;  %v305_v31 = vadd.f32 %v177_v21, %v48_v20  ;;  %v51_v32 = vld [vmem:[#allocation2 + $0xd0] sm:$0xff]  ;;  %v430_v34 = vmul.f32 0.5, %v302_v19 }
  0x18   :  { %550 = vst [vmem:[#allocation5 + $0x60] sm:$0xff] %v422_v2  ;;  %v180_v33 = vld [vmem:[#allocation2 + $0x4d0] sm:$0xff]  ;;  %v306_v35 = vadd.f32 %v178_v25, %v49_v24  ;;  %v52_v36 = vld [vmem:[#allocation2 + $0xd8] sm:$0xff]  ;;  %v431_v38 = vmul.f32 0.5, %v303_v23  ;;  %v307_v39 = vadd.f32 %v179_v29, %v50_v28  ;;  %v53_v40 = vld [vmem:[#allocation2 + $0xe0] sm:$0xff]  ;;  %v432_v42 = vmul.f32 0.5, %v304_v27 }
  0x19   :  { %551 = vst [vmem:[#allocation5 + $0x68] sm:$0xff] %v423_v6  ;;  %v181_v37 = vld [vmem:[#allocation2 + $0x4d8] sm:$0xff]  ;;  %v182_v41 = vld [vmem:[#allocation2 + $0x4e0] sm:$0xff]  ;;  %v308_v43 = vadd.f32 %v180_v33, %v51_v32  ;;  %v54_v44 = vld [vmem:[#allocation2 + $0xe8] sm:$0xff]  ;;  %v433_v46 = vmul.f32 0.5, %v305_v31 }
  0x1a   :  { %552 = vst [vmem:[#allocation5 + $0x70] sm:$0xff] %v424_v10  ;;  %v183_v45 = vld [vmem:[#allocation2 + $0x4e8] sm:$0xff]  ;;  %v309_v47 = vadd.f32 %v181_v37, %v52_v36  ;;  %v55_v48 = vld [vmem:[#allocation2 + $0xf0] sm:$0xff]  ;;  %v434_v50 = vmul.f32 0.5, %v306_v35  ;;  %v310_v51 = vadd.f32 %v182_v41, %v53_v40  ;;  %v56_v52 = vld [vmem:[#allocation2 + $0xf8] sm:$0xff]  ;;  %v435_v54 = vmul.f32 0.5, %v307_v39 }
  0x1b   :  { %553 = vst [vmem:[#allocation5 + $0x78] sm:$0xff] %v425_v14  ;;  %v184_v49 = vld [vmem:[#allocation2 + $0x4f0] sm:$0xff]  ;;  %v185_v53 = vld [vmem:[#allocation2 + $0x4f8] sm:$0xff]  ;;  %v311_v55 = vadd.f32 %v183_v45, %v54_v44  ;;  %v57_v56 = vld [vmem:[#allocation2 + $0x100] sm:$0xff]  ;;  %v436_v58 = vmul.f32 0.5, %v308_v43 }
  0x1c   :  { %554 = vst [vmem:[#allocation5 + $0x80] sm:$0xff] %v426_v18  ;;  %v186_v57 = vld [vmem:[#allocation2 + $0x500] sm:$0xff]  ;;  %v312_v59 = vadd.f32 %v184_v49, %v55_v48  ;;  %v58_v60 = vld [vmem:[#allocation2 + $0x108] sm:$0xff]  ;;  %v437_v62 = vmul.f32 0.5, %v309_v47  ;;  %v313_v63 = vadd.f32 %v185_v53, %v56_v52  ;;  %v59_v0 = vld [vmem:[#allocation2 + $0x110] sm:$0xff]  ;;  %v438_v2 = vmul.f32 0.5, %v310_v51 }
  0x1d   :  { %555 = vst [vmem:[#allocation5 + $0x88] sm:$0xff] %v427_v22  ;;  %v187_v61 = vld [vmem:[#allocation2 + $0x508] sm:$0xff]  ;;  %v188_v1 = vld [vmem:[#allocation2 + $0x510] sm:$0xff]  ;;  %v314_v3 = vadd.f32 %v186_v57, %v57_v56  ;;  %v60_v4 = vld [vmem:[#allocation2 + $0x118] sm:$0xff]  ;;  %v439_v6 = vmul.f32 0.5, %v311_v55 }
  0x1e   :  { %556 = vst [vmem:[#allocation5 + $0x90] sm:$0xff] %v428_v26  ;;  %v189_v5 = vld [vmem:[#allocation2 + $0x518] sm:$0xff]  ;;  %v315_v7 = vadd.f32 %v187_v61, %v58_v60  ;;  %v61_v8 = vld [vmem:[#allocation2 + $0x120] sm:$0xff]  ;;  %v440_v10 = vmul.f32 0.5, %v312_v59  ;;  %v316_v11 = vadd.f32 %v188_v1, %v59_v0  ;;  %v62_v12 = vld [vmem:[#allocation2 + $0x128] sm:$0xff]  ;;  %v441_v14 = vmul.f32 0.5, %v313_v63 }
  0x1f   :  { %557 = vst [vmem:[#allocation5 + $0x98] sm:$0xff] %v429_v30  ;;  %v190_v9 = vld [vmem:[#allocation2 + $0x520] sm:$0xff]  ;;  %v191_v13 = vld [vmem:[#allocation2 + $0x528] sm:$0xff]  ;;  %v317_v15 = vadd.f32 %v189_v5, %v60_v4  ;;  %v63_v16 = vld [vmem:[#allocation2 + $0x130] sm:$0xff]  ;;  %v442_v18 = vmul.f32 0.5, %v314_v3 }
  0x20   :  { %558 = vst [vmem:[#allocation5 + $0xa0] sm:$0xff] %v430_v34  ;;  %v192_v17 = vld [vmem:[#allocation2 + $0x530] sm:$0xff]  ;;  %v318_v19 = vadd.f32 %v190_v9, %v61_v8  ;;  %v64_v20 = vld [vmem:[#allocation2 + $0x138] sm:$0xff]  ;;  %v443_v22 = vmul.f32 0.5, %v315_v7  ;;  %v319_v23 = vadd.f32 %v191_v13, %v62_v12  ;;  %v65_v24 = vld [vmem:[#allocation2 + $0x140] sm:$0xff]  ;;  %v444_v26 = vmul.f32 0.5, %v316_v11 }
  0x21   :  { %559 = vst [vmem:[#allocation5 + $0xa8] sm:$0xff] %v431_v38  ;;  %v193_v21 = vld [vmem:[#allocation2 + $0x538] sm:$0xff]  ;;  %v194_v25 = vld [vmem:[#allocation2 + $0x540] sm:$0xff]  ;;  %v320_v27 = vadd.f32 %v192_v17, %v63_v16  ;;  %v66_v28 = vld [vmem:[#allocation2 + $0x148] sm:$0xff]  ;;  %v445_v30 = vmul.f32 0.5, %v317_v15 }
  0x22   :  { %560 = vst [vmem:[#allocation5 + $0xb0] sm:$0xff] %v432_v42  ;;  %v195_v29 = vld [vmem:[#allocation2 + $0x548] sm:$0xff]  ;;  %v321_v31 = vadd.f32 %v193_v21, %v64_v20  ;;  %v67_v32 = vld [vmem:[#allocation2 + $0x150] sm:$0xff]  ;;  %v446_v34 = vmul.f32 0.5, %v318_v19  ;;  %v322_v35 = vadd.f32 %v194_v25, %v65_v24  ;;  %v68_v36 = vld [vmem:[#allocation2 + $0x158] sm:$0xff]  ;;  %v447_v38 = vmul.f32 0.5, %v319_v23 }
  0x23   :  { %561 = vst [vmem:[#allocation5 + $0xb8] sm:$0xff] %v433_v46  ;;  %v196_v33 = vld [vmem:[#allocation2 + $0x550] sm:$0xff]  ;;  %v197_v37 = vld [vmem:[#allocation2 + $0x558] sm:$0xff]  ;;  %v323_v39 = vadd.f32 %v195_v29, %v66_v28  ;;  %v69_v40 = vld [vmem:[#allocation2 + $0x160] sm:$0xff]  ;;  %v448_v42 = vmul.f32 0.5, %v320_v27 }
  0x24   :  { %562 = vst [vmem:[#allocation5 + $0xc0] sm:$0xff] %v434_v50  ;;  %v198_v41 = vld [vmem:[#allocation2 + $0x560] sm:$0xff]  ;;  %v324_v43 = vadd.f32 %v196_v33, %v67_v32  ;;  %v70_v44 = vld [vmem:[#allocation2 + $0x168] sm:$0xff]  ;;  %v449_v46 = vmul.f32 0.5, %v321_v31  ;;  %v325_v47 = vadd.f32 %v197_v37, %v68_v36  ;;  %v71_v48 = vld [vmem:[#allocation2 + $0x170] sm:$0xff]  ;;  %v450_v50 = vmul.f32 0.5, %v322_v35 }
  0x25   :  { %563 = vst [vmem:[#allocation5 + $0xc8] sm:$0xff] %v435_v54  ;;  %v199_v45 = vld [vmem:[#allocation2 + $0x568] sm:$0xff]  ;;  %v200_v49 = vld [vmem:[#allocation2 + $0x570] sm:$0xff]  ;;  %v326_v51 = vadd.f32 %v198_v41, %v69_v40  ;;  %v72_v52 = vld [vmem:[#allocation2 + $0x178] sm:$0xff]  ;;  %v451_v54 = vmul.f32 0.5, %v323_v39 }
  0x26   :  { %564 = vst [vmem:[#allocation5 + $0xd0] sm:$0xff] %v436_v58  ;;  %v201_v53 = vld [vmem:[#allocation2 + $0x578] sm:$0xff]  ;;  %v327_v55 = vadd.f32 %v199_v45, %v70_v44  ;;  %v73_v56 = vld [vmem:[#allocation2 + $0x180] sm:$0xff]  ;;  %v452_v58 = vmul.f32 0.5, %v324_v43  ;;  %v328_v59 = vadd.f32 %v200_v49, %v71_v48  ;;  %v74_v60 = vld [vmem:[#allocation2 + $0x188] sm:$0xff] }
  0x27   :  { %565 = vst [vmem:[#allocation5 + $0xd8] sm:$0xff] %v437_v62  ;;  %v202_v57 = vld [vmem:[#allocation2 + $0x580] sm:$0xff]  ;;  %v203_v61 = vld [vmem:[#allocation2 + $0x588] sm:$0xff]  ;;  %v453_v62 = vmul.f32 0.5, %v325_v47  ;;  %v329_v63 = vadd.f32 %v201_v53, %v72_v52  ;;  %v75_v0 = vld [vmem:[#allocation2 + $0x190] sm:$0xff] }
  0x28   :  { %566 = vst [vmem:[#allocation5 + $0xe0] sm:$0xff] %v438_v2  ;;  %v204_v1 = vld [vmem:[#allocation2 + $0x590] sm:$0xff]  ;;  %v454_v2 = vmul.f32 0.5, %v326_v51  ;;  %v330_v3 = vadd.f32 %v202_v57, %v73_v56  ;;  %v76_v4 = vld [vmem:[#allocation2 + $0x198] sm:$0xff]  ;;  %v331_v7 = vadd.f32 %v203_v61, %v74_v60  ;;  %v77_v8 = vld [vmem:[#allocation2 + $0x1a0] sm:$0xff] }
  0x29   :  { %567 = vst [vmem:[#allocation5 + $0xe8] sm:$0xff] %v439_v6  ;;  %v205_v5 = vld [vmem:[#allocation2 + $0x598] sm:$0xff]  ;;  %v455_v6 = vmul.f32 0.5, %v327_v55  ;;  %v206_v9 = vld [vmem:[#allocation2 + $0x5a0] sm:$0xff]  ;;  %v332_v11 = vadd.f32 %v204_v1, %v75_v0  ;;  %v78_v12 = vld [vmem:[#allocation2 + $0x1a8] sm:$0xff] }
  0x2a   :  { %568 = vst [vmem:[#allocation5 + $0xf0] sm:$0xff] %v440_v10  ;;  %v456_v10 = vmul.f32 0.5, %v328_v59  ;;  %v207_v13 = vld [vmem:[#allocation2 + $0x5a8] sm:$0xff]  ;;  %v333_v15 = vadd.f32 %v205_v5, %v76_v4  ;;  %v79_v16 = vld [vmem:[#allocation2 + $0x1b0] sm:$0xff]  ;;  %v334_v19 = vadd.f32 %v206_v9, %v77_v8  ;;  %v80_v20 = vld [vmem:[#allocation2 + $0x1b8] sm:$0xff] }
  0x2b   :  { %569 = vst [vmem:[#allocation5 + $0xf8] sm:$0xff] %v441_v14  ;;  %v457_v14 = vmul.f32 0.5, %v329_v63  ;;  %v208_v17 = vld [vmem:[#allocation2 + $0x5b0] sm:$0xff]  ;;  %v209_v21 = vld [vmem:[#allocation2 + $0x5b8] sm:$0xff]  ;;  %v335_v23 = vadd.f32 %v207_v13, %v78_v12  ;;  %v81_v24 = vld [vmem:[#allocation2 + $0x1c0] sm:$0xff] }
  0x2c   :  { %570 = vst [vmem:[#allocation5 + $0x100] sm:$0xff] %v442_v18  ;;  %v458_v18 = vmul.f32 0.5, %v330_v3  ;;  %v210_v25 = vld [vmem:[#allocation2 + $0x5c0] sm:$0xff]  ;;  %v336_v27 = vadd.f32 %v208_v17, %v79_v16  ;;  %v82_v28 = vld [vmem:[#allocation2 + $0x1c8] sm:$0xff]  ;;  %v337_v31 = vadd.f32 %v209_v21, %v80_v20  ;;  %v83_v32 = vld [vmem:[#allocation2 + $0x1d0] sm:$0xff] }
  0x2d   :  { %571 = vst [vmem:[#allocation5 + $0x108] sm:$0xff] %v443_v22  ;;  %v459_v22 = vmul.f32 0.5, %v331_v7  ;;  %v211_v29 = vld [vmem:[#allocation2 + $0x5c8] sm:$0xff]  ;;  %v212_v33 = vld [vmem:[#allocation2 + $0x5d0] sm:$0xff]  ;;  %v338_v35 = vadd.f32 %v210_v25, %v81_v24  ;;  %v84_v36 = vld [vmem:[#allocation2 + $0x1d8] sm:$0xff] }
  0x2e   :  { %572 = vst [vmem:[#allocation5 + $0x110] sm:$0xff] %v444_v26  ;;  %v460_v26 = vmul.f32 0.5, %v332_v11  ;;  %v213_v37 = vld [vmem:[#allocation2 + $0x5d8] sm:$0xff]  ;;  %v339_v39 = vadd.f32 %v211_v29, %v82_v28  ;;  %v85_v40 = vld [vmem:[#allocation2 + $0x1e0] sm:$0xff]  ;;  %v340_v43 = vadd.f32 %v212_v33, %v83_v32  ;;  %v86_v44 = vld [vmem:[#allocation2 + $0x1e8] sm:$0xff] }
  0x2f   :  { %573 = vst [vmem:[#allocation5 + $0x118] sm:$0xff] %v445_v30  ;;  %v461_v30 = vmul.f32 0.5, %v333_v15  ;;  %v214_v41 = vld [vmem:[#allocation2 + $0x5e0] sm:$0xff]  ;;  %v215_v45 = vld [vmem:[#allocation2 + $0x5e8] sm:$0xff]  ;;  %v341_v47 = vadd.f32 %v213_v37, %v84_v36  ;;  %v87_v48 = vld [vmem:[#allocation2 + $0x1f0] sm:$0xff] }
  0x30   :  { %574 = vst [vmem:[#allocation5 + $0x120] sm:$0xff] %v446_v34  ;;  %v462_v34 = vmul.f32 0.5, %v334_v19  ;;  %v216_v49 = vld [vmem:[#allocation2 + $0x5f0] sm:$0xff]  ;;  %v342_v51 = vadd.f32 %v214_v41, %v85_v40  ;;  %v88_v52 = vld [vmem:[#allocation2 + $0x1f8] sm:$0xff]  ;;  %v343_v55 = vadd.f32 %v215_v45, %v86_v44  ;;  %v89_v56 = vld [vmem:[#allocation2 + $0x200] sm:$0xff] }
  0x31   :  { %575 = vst [vmem:[#allocation5 + $0x128] sm:$0xff] %v447_v38  ;;  %v463_v38 = vmul.f32 0.5, %v335_v23  ;;  %v217_v53 = vld [vmem:[#allocation2 + $0x5f8] sm:$0xff]  ;;  %v218_v57 = vld [vmem:[#allocation2 + $0x600] sm:$0xff]  ;;  %v344_v59 = vadd.f32 %v216_v49, %v87_v48  ;;  %v90_v60 = vld [vmem:[#allocation2 + $0x208] sm:$0xff] }
  0x32   :  { %576 = vst [vmem:[#allocation5 + $0x130] sm:$0xff] %v448_v42  ;;  %v464_v42 = vmul.f32 0.5, %v336_v27  ;;  %v219_v61 = vld [vmem:[#allocation2 + $0x608] sm:$0xff]  ;;  %v345_v63 = vadd.f32 %v217_v53, %v88_v52  ;;  %v91_v0 = vld [vmem:[#allocation2 + $0x210] sm:$0xff]  ;;  %v346_v3 = vadd.f32 %v218_v57, %v89_v56  ;;  %v92_v4 = vld [vmem:[#allocation2 + $0x218] sm:$0xff] }
  0x33   :  { %577 = vst [vmem:[#allocation5 + $0x138] sm:$0xff] %v449_v46  ;;  %v465_v46 = vmul.f32 0.5, %v337_v31  ;;  %v220_v1 = vld [vmem:[#allocation2 + $0x610] sm:$0xff]  ;;  %v221_v5 = vld [vmem:[#allocation2 + $0x618] sm:$0xff]  ;;  %v347_v7 = vadd.f32 %v219_v61, %v90_v60  ;;  %v93_v8 = vld [vmem:[#allocation2 + $0x220] sm:$0xff] }
  0x34   :  { %578 = vst [vmem:[#allocation5 + $0x140] sm:$0xff] %v450_v50  ;;  %v466_v50 = vmul.f32 0.5, %v338_v35  ;;  %v222_v9 = vld [vmem:[#allocation2 + $0x620] sm:$0xff]  ;;  %v348_v11 = vadd.f32 %v220_v1, %v91_v0  ;;  %v94_v12 = vld [vmem:[#allocation2 + $0x228] sm:$0xff]  ;;  %v349_v15 = vadd.f32 %v221_v5, %v92_v4  ;;  %v95_v16 = vld [vmem:[#allocation2 + $0x230] sm:$0xff] }
  0x35   :  { %579 = vst [vmem:[#allocation5 + $0x148] sm:$0xff] %v451_v54  ;;  %v467_v54 = vmul.f32 0.5, %v339_v39  ;;  %v223_v13 = vld [vmem:[#allocation2 + $0x628] sm:$0xff]  ;;  %v224_v17 = vld [vmem:[#allocation2 + $0x630] sm:$0xff]  ;;  %v350_v19 = vadd.f32 %v222_v9, %v93_v8  ;;  %v96_v20 = vld [vmem:[#allocation2 + $0x238] sm:$0xff] }
  0x36   :  { %580 = vst [vmem:[#allocation5 + $0x150] sm:$0xff] %v452_v58  ;;  %v468_v58 = vmul.f32 0.5, %v340_v43  ;;  %v225_v21 = vld [vmem:[#allocation2 + $0x638] sm:$0xff]  ;;  %v351_v23 = vadd.f32 %v223_v13, %v94_v12  ;;  %v97_v24 = vld [vmem:[#allocation2 + $0x240] sm:$0xff]  ;;  %v352_v27 = vadd.f32 %v224_v17, %v95_v16  ;;  %v98_v28 = vld [vmem:[#allocation2 + $0x248] sm:$0xff] }
  0x37   :  { %581 = vst [vmem:[#allocation5 + $0x158] sm:$0xff] %v453_v62  ;;  %v469_v62 = vmul.f32 0.5, %v341_v47  ;;  %v226_v25 = vld [vmem:[#allocation2 + $0x640] sm:$0xff]  ;;  %v227_v29 = vld [vmem:[#allocation2 + $0x648] sm:$0xff]  ;;  %v353_v31 = vadd.f32 %v225_v21, %v96_v20  ;;  %v99_v32 = vld [vmem:[#allocation2 + $0x250] sm:$0xff] }
  0x38   :  { %582 = vst [vmem:[#allocation5 + $0x160] sm:$0xff] %v454_v2  ;;  %v470_v2 = vmul.f32 0.5, %v342_v51  ;;  %v228_v33 = vld [vmem:[#allocation2 + $0x650] sm:$0xff]  ;;  %v354_v35 = vadd.f32 %v226_v25, %v97_v24  ;;  %v100_v36 = vld [vmem:[#allocation2 + $0x258] sm:$0xff]  ;;  %v355_v39 = vadd.f32 %v227_v29, %v98_v28  ;;  %v101_v40 = vld [vmem:[#allocation2 + $0x260] sm:$0xff] }
  0x39   :  { %583 = vst [vmem:[#allocation5 + $0x168] sm:$0xff] %v455_v6  ;;  %v471_v6 = vmul.f32 0.5, %v343_v55  ;;  %v229_v37 = vld [vmem:[#allocation2 + $0x658] sm:$0xff]  ;;  %v230_v41 = vld [vmem:[#allocation2 + $0x660] sm:$0xff]  ;;  %v356_v43 = vadd.f32 %v228_v33, %v99_v32  ;;  %v102_v44 = vld [vmem:[#allocation2 + $0x268] sm:$0xff] }
  0x3a   :  { %584 = vst [vmem:[#allocation5 + $0x170] sm:$0xff] %v456_v10  ;;  %v472_v10 = vmul.f32 0.5, %v344_v59  ;;  %v231_v45 = vld [vmem:[#allocation2 + $0x668] sm:$0xff]  ;;  %v357_v47 = vadd.f32 %v229_v37, %v100_v36  ;;  %v103_v48 = vld [vmem:[#allocation2 + $0x270] sm:$0xff]  ;;  %v358_v51 = vadd.f32 %v230_v41, %v101_v40  ;;  %v104_v52 = vld [vmem:[#allocation2 + $0x278] sm:$0xff] }
  0x3b   :  { %585 = vst [vmem:[#allocation5 + $0x178] sm:$0xff] %v457_v14  ;;  %v473_v14 = vmul.f32 0.5, %v345_v63  ;;  %v232_v49 = vld [vmem:[#allocation2 + $0x670] sm:$0xff]  ;;  %v233_v53 = vld [vmem:[#allocation2 + $0x678] sm:$0xff]  ;;  %v359_v55 = vadd.f32 %v231_v45, %v102_v44  ;;  %v105_v56 = vld [vmem:[#allocation2 + $0x280] sm:$0xff] }
  0x3c   :  { %586 = vst [vmem:[#allocation5 + $0x180] sm:$0xff] %v458_v18  ;;  %v474_v18 = vmul.f32 0.5, %v346_v3  ;;  %v234_v57 = vld [vmem:[#allocation2 + $0x680] sm:$0xff]  ;;  %v360_v59 = vadd.f32 %v232_v49, %v103_v48  ;;  %v106_v60 = vld [vmem:[#allocation2 + $0x288] sm:$0xff]  ;;  %v361_v63 = vadd.f32 %v233_v53, %v104_v52  ;;  %v107_v0 = vld [vmem:[#allocation2 + $0x290] sm:$0xff] }
  0x3d   :  { %587 = vst [vmem:[#allocation5 + $0x188] sm:$0xff] %v459_v22  ;;  %v475_v22 = vmul.f32 0.5, %v347_v7  ;;  %v235_v61 = vld [vmem:[#allocation2 + $0x688] sm:$0xff]  ;;  %v236_v1 = vld [vmem:[#allocation2 + $0x690] sm:$0xff]  ;;  %v362_v3 = vadd.f32 %v234_v57, %v105_v56  ;;  %v108_v4 = vld [vmem:[#allocation2 + $0x298] sm:$0xff] }
  0x3e   :  { %588 = vst [vmem:[#allocation5 + $0x190] sm:$0xff] %v460_v26  ;;  %v476_v26 = vmul.f32 0.5, %v348_v11  ;;  %v237_v5 = vld [vmem:[#allocation2 + $0x698] sm:$0xff]  ;;  %v363_v7 = vadd.f32 %v235_v61, %v106_v60  ;;  %v109_v8 = vld [vmem:[#allocation2 + $0x2a0] sm:$0xff]  ;;  %v364_v11 = vadd.f32 %v236_v1, %v107_v0  ;;  %v110_v12 = vld [vmem:[#allocation2 + $0x2a8] sm:$0xff] }
  0x3f   :  { %589 = vst [vmem:[#allocation5 + $0x198] sm:$0xff] %v461_v30  ;;  %v477_v30 = vmul.f32 0.5, %v349_v15  ;;  %v238_v9 = vld [vmem:[#allocation2 + $0x6a0] sm:$0xff]  ;;  %v239_v13 = vld [vmem:[#allocation2 + $0x6a8] sm:$0xff]  ;;  %v365_v15 = vadd.f32 %v237_v5, %v108_v4  ;;  %v111_v16 = vld [vmem:[#allocation2 + $0x2b0] sm:$0xff] }
  0x40   :  { %590 = vst [vmem:[#allocation5 + $0x1a0] sm:$0xff] %v462_v34  ;;  %v478_v34 = vmul.f32 0.5, %v350_v19  ;;  %v240_v17 = vld [vmem:[#allocation2 + $0x6b0] sm:$0xff]  ;;  %v366_v19 = vadd.f32 %v238_v9, %v109_v8  ;;  %v112_v20 = vld [vmem:[#allocation2 + $0x2b8] sm:$0xff]  ;;  %v113_v24 = vld [vmem:[#allocation2 + $0x2c0] sm:$0xff] }
  0x41   :  { %591 = vst [vmem:[#allocation5 + $0x1a8] sm:$0xff] %v463_v38  ;;  %v479_v38 = vmul.f32 0.5, %v351_v23  ;;  %v241_v21 = vld [vmem:[#allocation2 + $0x6b8] sm:$0xff]  ;;  %v367_v23 = vadd.f32 %v239_v13, %v110_v12  ;;  %v242_v25 = vld [vmem:[#allocation2 + $0x6c0] sm:$0xff]  ;;  %v114_v28 = vld [vmem:[#allocation2 + $0x2c8] sm:$0xff] }
  0x42   :  { %592 = vst [vmem:[#allocation5 + $0x1b0] sm:$0xff] %v464_v42  ;;  %v480_v42 = vmul.f32 0.5, %v352_v27  ;;  %v368_v27 = vadd.f32 %v240_v17, %v111_v16  ;;  %v243_v29 = vld [vmem:[#allocation2 + $0x6c8] sm:$0xff]  ;;  %v115_v32 = vld [vmem:[#allocation2 + $0x2d0] sm:$0xff]  ;;  %v116_v36 = vld [vmem:[#allocation2 + $0x2d8] sm:$0xff] }
  0x43   :  { %593 = vst [vmem:[#allocation5 + $0x1b8] sm:$0xff] %v465_v46  ;;  %v481_v46 = vmul.f32 0.5, %v353_v31  ;;  %v369_v31 = vadd.f32 %v241_v21, %v112_v20  ;;  %v244_v33 = vld [vmem:[#allocation2 + $0x6d0] sm:$0xff]  ;;  %v245_v37 = vld [vmem:[#allocation2 + $0x6d8] sm:$0xff]  ;;  %v117_v40 = vld [vmem:[#allocation2 + $0x2e0] sm:$0xff] }
  0x44   :  { %594 = vst [vmem:[#allocation5 + $0x1c0] sm:$0xff] %v466_v50  ;;  %v482_v50 = vmul.f32 0.5, %v354_v35  ;;  %v370_v35 = vadd.f32 %v242_v25, %v113_v24  ;;  %v246_v41 = vld [vmem:[#allocation2 + $0x6e0] sm:$0xff]  ;;  %v118_v44 = vld [vmem:[#allocation2 + $0x2e8] sm:$0xff]  ;;  %v119_v48 = vld [vmem:[#allocation2 + $0x2f0] sm:$0xff] }
  0x45   :  { %595 = vst [vmem:[#allocation5 + $0x1c8] sm:$0xff] %v467_v54  ;;  %v483_v54 = vmul.f32 0.5, %v355_v39  ;;  %v371_v39 = vadd.f32 %v243_v29, %v114_v28  ;;  %v247_v45 = vld [vmem:[#allocation2 + $0x6e8] sm:$0xff]  ;;  %v248_v49 = vld [vmem:[#allocation2 + $0x6f0] sm:$0xff]  ;;  %v120_v52 = vld [vmem:[#allocation2 + $0x2f8] sm:$0xff] }
  0x46   :  { %596 = vst [vmem:[#allocation5 + $0x1d0] sm:$0xff] %v468_v58  ;;  %v484_v58 = vmul.f32 0.5, %v356_v43  ;;  %v372_v43 = vadd.f32 %v244_v33, %v115_v32  ;;  %v249_v53 = vld [vmem:[#allocation2 + $0x6f8] sm:$0xff]  ;;  %v121_v56 = vld [vmem:[#allocation2 + $0x300] sm:$0xff]  ;;  %v122_v60 = vld [vmem:[#allocation2 + $0x308] sm:$0xff] }
  0x47   :  { %597 = vst [vmem:[#allocation5 + $0x1d8] sm:$0xff] %v469_v62  ;;  %v485_v62 = vmul.f32 0.5, %v357_v47  ;;  %v373_v47 = vadd.f32 %v245_v37, %v116_v36  ;;  %v250_v57 = vld [vmem:[#allocation2 + $0x700] sm:$0xff]  ;;  %v251_v61 = vld [vmem:[#allocation2 + $0x708] sm:$0xff]  ;;  %v123_v0 = vld [vmem:[#allocation2 + $0x310] sm:$0xff] }
  0x48   :  { %598 = vst [vmem:[#allocation5 + $0x1e0] sm:$0xff] %v470_v2  ;;  %v486_v2 = vmul.f32 0.5, %v358_v51  ;;  %v374_v51 = vadd.f32 %v246_v41, %v117_v40  ;;  %v252_v1 = vld [vmem:[#allocation2 + $0x710] sm:$0xff]  ;;  %v124_v4 = vld [vmem:[#allocation2 + $0x318] sm:$0xff]  ;;  %v125_v8 = vld [vmem:[#allocation2 + $0x320] sm:$0xff] }
  0x49   :  { %599 = vst [vmem:[#allocation5 + $0x1e8] sm:$0xff] %v471_v6  ;;  %v487_v6 = vmul.f32 0.5, %v359_v55  ;;  %v375_v55 = vadd.f32 %v247_v45, %v118_v44  ;;  %v253_v5 = vld [vmem:[#allocation2 + $0x718] sm:$0xff]  ;;  %v254_v9 = vld [vmem:[#allocation2 + $0x720] sm:$0xff]  ;;  %v126_v12 = vld [vmem:[#allocation2 + $0x328] sm:$0xff] }
  0x4a   :  { %600 = vst [vmem:[#allocation5 + $0x1f0] sm:$0xff] %v472_v10  ;;  %v488_v10 = vmul.f32 0.5, %v360_v59  ;;  %v376_v59 = vadd.f32 %v248_v49, %v119_v48  ;;  %v255_v13 = vld [vmem:[#allocation2 + $0x728] sm:$0xff]  ;;  %v127_v16 = vld [vmem:[#allocation2 + $0x330] sm:$0xff]  ;;  %v128_v20 = vld [vmem:[#allocation2 + $0x338] sm:$0xff] }
  0x4b   :  { %601 = vst [vmem:[#allocation5 + $0x1f8] sm:$0xff] %v473_v14  ;;  %v489_v14 = vmul.f32 0.5, %v361_v63  ;;  %v377_v63 = vadd.f32 %v249_v53, %v120_v52  ;;  %v256_v17 = vld [vmem:[#allocation2 + $0x730] sm:$0xff]  ;;  %v257_v21 = vld [vmem:[#allocation2 + $0x738] sm:$0xff]  ;;  %v129_v24 = vld [vmem:[#allocation2 + $0x340] sm:$0xff] }
  0x4c   :  { %602 = vst [vmem:[#allocation5 + $0x200] sm:$0xff] %v474_v18  ;;  %v490_v18 = vmul.f32 0.5, %v362_v3  ;;  %v378_v3 = vadd.f32 %v250_v57, %v121_v56  ;;  %v258_v25 = vld [vmem:[#allocation2 + $0x740] sm:$0xff]  ;;  %v130_v28 = vld [vmem:[#allocation2 + $0x348] sm:$0xff]  ;;  %v131_v32 = vld [vmem:[#allocation2 + $0x350] sm:$0xff] }
  0x4d   :  { %603 = vst [vmem:[#allocation5 + $0x208] sm:$0xff] %v475_v22  ;;  %v491_v22 = vmul.f32 0.5, %v363_v7  ;;  %v379_v7 = vadd.f32 %v251_v61, %v122_v60  ;;  %v259_v29 = vld [vmem:[#allocation2 + $0x748] sm:$0xff]  ;;  %v260_v33 = vld [vmem:[#allocation2 + $0x750] sm:$0xff]  ;;  %v132_v36 = vld [vmem:[#allocation2 + $0x358] sm:$0xff] }
  0x4e   :  { %604 = vst [vmem:[#allocation5 + $0x210] sm:$0xff] %v476_v26  ;;  %v492_v26 = vmul.f32 0.5, %v364_v11  ;;  %v380_v11 = vadd.f32 %v252_v1, %v123_v0  ;;  %v261_v37 = vld [vmem:[#allocation2 + $0x758] sm:$0xff]  ;;  %v133_v40 = vld [vmem:[#allocation2 + $0x360] sm:$0xff]  ;;  %v134_v44 = vld [vmem:[#allocation2 + $0x368] sm:$0xff] }
  0x4f   :  { %605 = vst [vmem:[#allocation5 + $0x218] sm:$0xff] %v477_v30  ;;  %v493_v30 = vmul.f32 0.5, %v365_v15  ;;  %v381_v15 = vadd.f32 %v253_v5, %v124_v4  ;;  %v262_v41 = vld [vmem:[#allocation2 + $0x760] sm:$0xff]  ;;  %v263_v45 = vld [vmem:[#allocation2 + $0x768] sm:$0xff]  ;;  %v135_v48 = vld [vmem:[#allocation2 + $0x370] sm:$0xff] }
  0x50   :  { %606 = vst [vmem:[#allocation5 + $0x220] sm:$0xff] %v478_v34  ;;  %v494_v34 = vmul.f32 0.5, %v366_v19  ;;  %v382_v19 = vadd.f32 %v254_v9, %v125_v8  ;;  %v264_v49 = vld [vmem:[#allocation2 + $0x770] sm:$0xff]  ;;  %v136_v52 = vld [vmem:[#allocation2 + $0x378] sm:$0xff]  ;;  %v137_v56 = vld [vmem:[#allocation2 + $0x380] sm:$0xff] }
  0x51   :  { %607 = vst [vmem:[#allocation5 + $0x228] sm:$0xff] %v479_v38  ;;  %v495_v38 = vmul.f32 0.5, %v367_v23  ;;  %v383_v23 = vadd.f32 %v255_v13, %v126_v12  ;;  %v265_v53 = vld [vmem:[#allocation2 + $0x778] sm:$0xff]  ;;  %v266_v57 = vld [vmem:[#allocation2 + $0x780] sm:$0xff]  ;;  %v138_v60 = vld [vmem:[#allocation2 + $0x388] sm:$0xff] }
  0x52   :  { %608 = vst [vmem:[#allocation5 + $0x230] sm:$0xff] %v480_v42  ;;  %v496_v42 = vmul.f32 0.5, %v368_v27  ;;  %v384_v27 = vadd.f32 %v256_v17, %v127_v16  ;;  %v267_v61 = vld [vmem:[#allocation2 + $0x788] sm:$0xff]  ;;  %v139_v0 = vld [vmem:[#allocation2 + $0x390] sm:$0xff]  ;;  %v140_v4 = vld [vmem:[#allocation2 + $0x398] sm:$0xff] }
  0x53   :  { %609 = vst [vmem:[#allocation5 + $0x238] sm:$0xff] %v481_v46  ;;  %v497_v46 = vmul.f32 0.5, %v369_v31  ;;  %v385_v31 = vadd.f32 %v257_v21, %v128_v20  ;;  %v268_v1 = vld [vmem:[#allocation2 + $0x790] sm:$0xff]  ;;  %v269_v5 = vld [vmem:[#allocation2 + $0x798] sm:$0xff]  ;;  %v141_v8 = vld [vmem:[#allocation2 + $0x3a0] sm:$0xff] }
  0x54   :  { %610 = vst [vmem:[#allocation5 + $0x240] sm:$0xff] %v482_v50  ;;  %v498_v50 = vmul.f32 0.5, %v370_v35  ;;  %v386_v35 = vadd.f32 %v258_v25, %v129_v24  ;;  %v270_v9 = vld [vmem:[#allocation2 + $0x7a0] sm:$0xff]  ;;  %v142_v12 = vld [vmem:[#allocation2 + $0x3a8] sm:$0xff]  ;;  %v143_v16 = vld [vmem:[#allocation2 + $0x3b0] sm:$0xff] }
  0x55   :  { %611 = vst [vmem:[#allocation5 + $0x248] sm:$0xff] %v483_v54  ;;  %v499_v54 = vmul.f32 0.5, %v371_v39  ;;  %v387_v39 = vadd.f32 %v259_v29, %v130_v28  ;;  %v271_v13 = vld [vmem:[#allocation2 + $0x7a8] sm:$0xff]  ;;  %v272_v17 = vld [vmem:[#allocation2 + $0x7b0] sm:$0xff]  ;;  %v144_v20 = vld [vmem:[#allocation2 + $0x3b8] sm:$0xff] }
  0x56   :  { %612 = vst [vmem:[#allocation5 + $0x250] sm:$0xff] %v484_v58  ;;  %v500_v58 = vmul.f32 0.5, %v372_v43  ;;  %v388_v43 = vadd.f32 %v260_v33, %v131_v32  ;;  %v273_v21 = vld [vmem:[#allocation2 + $0x7b8] sm:$0xff]  ;;  %v145_v24 = vld [vmem:[#allocation2 + $0x3c0] sm:$0xff]  ;;  %v146_v28 = vld [vmem:[#allocation2 + $0x3c8] sm:$0xff] }
  0x57   :  { %613 = vst [vmem:[#allocation5 + $0x258] sm:$0xff] %v485_v62  ;;  %v501_v62 = vmul.f32 0.5, %v373_v47  ;;  %v389_v47 = vadd.f32 %v261_v37, %v132_v36  ;;  %v274_v25 = vld [vmem:[#allocation2 + $0x7c0] sm:$0xff]  ;;  %v275_v29 = vld [vmem:[#allocation2 + $0x7c8] sm:$0xff]  ;;  %v147_v32 = vld [vmem:[#allocation2 + $0x3d0] sm:$0xff] }
  0x58   :  { %614 = vst [vmem:[#allocation5 + $0x260] sm:$0xff] %v486_v2  ;;  %v502_v2 = vmul.f32 0.5, %v374_v51  ;;  %v390_v51 = vadd.f32 %v262_v41, %v133_v40  ;;  %v276_v33 = vld [vmem:[#allocation2 + $0x7d0] sm:$0xff]  ;;  %v148_v36 = vld [vmem:[#allocation2 + $0x3d8] sm:$0xff]  ;;  %v149_v40 = vld [vmem:[#allocation2 + $0x3e0] sm:$0xff] }
  0x59   :  { %615 = vst [vmem:[#allocation5 + $0x268] sm:$0xff] %v487_v6  ;;  %v503_v6 = vmul.f32 0.5, %v375_v55  ;;  %v391_v55 = vadd.f32 %v263_v45, %v134_v44  ;;  %v277_v37 = vld [vmem:[#allocation2 + $0x7d8] sm:$0xff]  ;;  %v278_v41 = vld [vmem:[#allocation2 + $0x7e0] sm:$0xff]  ;;  %v150_v44 = vld [vmem:[#allocation2 + $0x3e8] sm:$0xff] }
  0x5a   :  { %616 = vst [vmem:[#allocation5 + $0x270] sm:$0xff] %v488_v10  ;;  %v504_v10 = vmul.f32 0.5, %v376_v59  ;;  %v392_v59 = vadd.f32 %v264_v49, %v135_v48  ;;  %v279_v45 = vld [vmem:[#allocation2 + $0x7e8] sm:$0xff]  ;;  %v151_v48 = vld [vmem:[#allocation2 + $0x3f0] sm:$0xff] }
  0x5b   :  { %617 = vst [vmem:[#allocation5 + $0x278] sm:$0xff] %v489_v14  ;;  %v505_v14 = vmul.f32 0.5, %v377_v63  ;;  %v393_v63 = vadd.f32 %v265_v53, %v136_v52  ;;  %v280_v49 = vld [vmem:[#allocation2 + $0x7f0] sm:$0xff]  ;;  %v152_v52 = vld [vmem:[#allocation2 + $0x3f8] sm:$0xff] }
  0x5c   :  { %618 = vst [vmem:[#allocation5 + $0x280] sm:$0xff] %v490_v18  ;;  %v506_v18 = vmul.f32 0.5, %v378_v3  ;;  %v394_v3 = vadd.f32 %v266_v57, %v137_v56  ;;  %v281_v53 = vld [vmem:[#allocation2 + $0x7f8] sm:$0xff]  ;;  %v408_v57 = vadd.f32 %v280_v49, %v151_v48 }
  0x5d   :  { %619 = vst [vmem:[#allocation5 + $0x288] sm:$0xff] %v491_v22  ;;  %v507_v22 = vmul.f32 0.5, %v379_v7  ;;  %v395_v7 = vadd.f32 %v267_v61, %v138_v60 }
  0x5e   :  { %620 = vst [vmem:[#allocation5 + $0x290] sm:$0xff] %v492_v26  ;;  %v508_v26 = vmul.f32 0.5, %v380_v11  ;;  %v396_v11 = vadd.f32 %v268_v1, %v139_v0 }
  0x5f   :  { %621 = vst [vmem:[#allocation5 + $0x298] sm:$0xff] %v493_v30  ;;  %v509_v30 = vmul.f32 0.5, %v381_v15  ;;  %v397_v15 = vadd.f32 %v269_v5, %v140_v4 }
  0x60   :  { %622 = vst [vmem:[#allocation5 + $0x2a0] sm:$0xff] %v494_v34  ;;  %v510_v34 = vmul.f32 0.5, %v382_v19  ;;  %v398_v19 = vadd.f32 %v270_v9, %v141_v8 }
  0x61   :  { %623 = vst [vmem:[#allocation5 + $0x2a8] sm:$0xff] %v495_v38  ;;  %v511_v38 = vmul.f32 0.5, %v383_v23  ;;  %v399_v23 = vadd.f32 %v271_v13, %v142_v12 }
  0x62   :  { %624 = vst [vmem:[#allocation5 + $0x2b0] sm:$0xff] %v496_v42  ;;  %v512_v42 = vmul.f32 0.5, %v384_v27  ;;  %v400_v27 = vadd.f32 %v272_v17, %v143_v16 }
  0x63   :  { %625 = vst [vmem:[#allocation5 + $0x2b8] sm:$0xff] %v497_v46  ;;  %v513_v46 = vmul.f32 0.5, %v385_v31  ;;  %v401_v31 = vadd.f32 %v273_v21, %v144_v20 }
  0x64   :  { %626 = vst [vmem:[#allocation5 + $0x2c0] sm:$0xff] %v498_v50  ;;  %v514_v50 = vmul.f32 0.5, %v386_v35  ;;  %v402_v35 = vadd.f32 %v274_v25, %v145_v24 }
  0x65   :  { %627 = vst [vmem:[#allocation5 + $0x2c8] sm:$0xff] %v499_v54  ;;  %v515_v54 = vmul.f32 0.5, %v387_v39  ;;  %v403_v39 = vadd.f32 %v275_v29, %v146_v28 }
  0x66   :  { %628 = vst [vmem:[#allocation5 + $0x2d0] sm:$0xff] %v500_v58  ;;  %v516_v58 = vmul.f32 0.5, %v388_v43  ;;  %v404_v43 = vadd.f32 %v276_v33, %v147_v32 }
  0x67   :  { %629 = vst [vmem:[#allocation5 + $0x2d8] sm:$0xff] %v501_v62  ;;  %v517_v62 = vmul.f32 0.5, %v389_v47  ;;  %v405_v47 = vadd.f32 %v277_v37, %v148_v36 }
  0x68   :  { %630 = vst [vmem:[#allocation5 + $0x2e0] sm:$0xff] %v502_v2  ;;  %v518_v2 = vmul.f32 0.5, %v390_v51  ;;  %v406_v51 = vadd.f32 %v278_v41, %v149_v40  ;;  %v532_v56 = vmul.f32 0.5, %v404_v43 }
  0x69   :  { %631 = vst [vmem:[#allocation5 + $0x2e8] sm:$0xff] %v503_v6  ;;  %v519_v6 = vmul.f32 0.5, %v391_v55  ;;  %v407_v55 = vadd.f32 %v279_v45, %v150_v44 }
  0x6a   :  { %632 = vst [vmem:[#allocation5 + $0x2f0] sm:$0xff] %v504_v10  ;;  %v520_v10 = vmul.f32 0.5, %v392_v59  ;;  %v409_v59 = vadd.f32 %v281_v53, %v152_v52  ;;  %v534_v60 = vmul.f32 0.5, %v406_v51 }
  0x6b   :  { %633 = vst [vmem:[#allocation5 + $0x2f8] sm:$0xff] %v505_v14  ;;  %v521_v14 = vmul.f32 0.5, %v393_v63  ;;  %v535_v61 = vmul.f32 0.5, %v407_v55 }
  0x6c   :  { %634 = vst [vmem:[#allocation5 + $0x300] sm:$0xff] %v506_v18  ;;  %v522_v18 = vmul.f32 0.5, %v394_v3  ;;  %v537_v63 = vmul.f32 0.5, %v409_v59 }
  0x6d   :  { %635 = vst [vmem:[#allocation5 + $0x308] sm:$0xff] %v507_v22  ;;  %v523_v22 = vmul.f32 0.5, %v395_v7 }
  0x6e   :  { %636 = vst [vmem:[#allocation5 + $0x310] sm:$0xff] %v508_v26  ;;  %v524_v26 = vmul.f32 0.5, %v396_v11 }
  0x6f   :  { %637 = vst [vmem:[#allocation5 + $0x318] sm:$0xff] %v509_v30  ;;  %v525_v30 = vmul.f32 0.5, %v397_v15 }
  0x70   :  { %638 = vst [vmem:[#allocation5 + $0x320] sm:$0xff] %v510_v34  ;;  %v526_v34 = vmul.f32 0.5, %v398_v19 }
  0x71   :  { %639 = vst [vmem:[#allocation5 + $0x328] sm:$0xff] %v511_v38  ;;  %v527_v38 = vmul.f32 0.5, %v399_v23 }
  0x72   :  { %640 = vst [vmem:[#allocation5 + $0x330] sm:$0xff] %v512_v42  ;;  %v528_v42 = vmul.f32 0.5, %v400_v27 }
  0x73   :  { %641 = vst [vmem:[#allocation5 + $0x338] sm:$0xff] %v513_v46  ;;  %v529_v46 = vmul.f32 0.5, %v401_v31 }
  0x74   :  { %642 = vst [vmem:[#allocation5 + $0x340] sm:$0xff] %v514_v50  ;;  %v530_v50 = vmul.f32 0.5, %v402_v35 }
  0x75   :  { %643 = vst [vmem:[#allocation5 + $0x348] sm:$0xff] %v515_v54  ;;  %v531_v54 = vmul.f32 0.5, %v403_v39 }
  0x76   :  { %644 = vst [vmem:[#allocation5 + $0x350] sm:$0xff] %v516_v58  ;;  %v533_v58 = vmul.f32 0.5, %v405_v47 }
  0x77   :  { %645 = vst [vmem:[#allocation5 + $0x358] sm:$0xff] %v517_v62  ;;  %v536_v62 = vmul.f32 0.5, %v408_v57 }
  0x78   :  { %646 = vst [vmem:[#allocation5 + $0x360] sm:$0xff] %v518_v2 }
  0x79   :  { %647 = vst [vmem:[#allocation5 + $0x368] sm:$0xff] %v519_v6 }
  0x7a   :  { %648 = vst [vmem:[#allocation5 + $0x370] sm:$0xff] %v520_v10 }
  0x7b   :  { %649 = vst [vmem:[#allocation5 + $0x378] sm:$0xff] %v521_v14 }
  0x7c   :  { %650 = vst [vmem:[#allocation5 + $0x380] sm:$0xff] %v522_v18 }
  0x7d   :  { %651 = vst [vmem:[#allocation5 + $0x388] sm:$0xff] %v523_v22 }
  0x7e   :  { %652 = vst [vmem:[#allocation5 + $0x390] sm:$0xff] %v524_v26 }
  0x7f   :  { %653 = vst [vmem:[#allocation5 + $0x398] sm:$0xff] %v525_v30 }
  0x80   :  { %654 = vst [vmem:[#allocation5 + $0x3a0] sm:$0xff] %v526_v34 }
  0x81   :  { %655 = vst [vmem:[#allocation5 + $0x3a8] sm:$0xff] %v527_v38 }
  0x82   :  { %656 = vst [vmem:[#allocation5 + $0x3b0] sm:$0xff] %v528_v42 }
  0x83   :  { %657 = vst [vmem:[#allocation5 + $0x3b8] sm:$0xff] %v529_v46 }
  0x84   :  { %658 = vst [vmem:[#allocation5 + $0x3c0] sm:$0xff] %v530_v50 }
  0x85   :  { %659 = vst [vmem:[#allocation5 + $0x3c8] sm:$0xff] %v531_v54 }
  0x86   :  { %660 = vst [vmem:[#allocation5 + $0x3d0] sm:$0xff] %v532_v56 }
  0x87   :  { %661 = vst [vmem:[#allocation5 + $0x3d8] sm:$0xff] %v533_v58 }
  0x88   :  { %662 = vst [vmem:[#allocation5 + $0x3e0] sm:$0xff] %v534_v60 }
  0x89   :  { %663 = vst [vmem:[#allocation5 + $0x3e8] sm:$0xff] %v535_v61 }
  0x8a   :  { %664 = vst [vmem:[#allocation5 + $0x3f0] sm:$0xff] %v536_v62 }
  0x8b   :  { %665 = vst [vmem:[#allocation5 + $0x3f8] sm:$0xff] %v537_v63 }
  0x8c   :  { %678 = dma.vmem_to_hbm [thread:$0]  %s671_s13, 16384, %s673_s16, [#allocation4], %s742_s11, %s742_s11, %s743_s12  }
  0x8d   :  { %739 = dma.done.wait [#allocation4], 16384  }
  0x8e   :  { %740 = vsyncadd [#allocation4], 4294950912 }
  0x8f   :  { %683 = vsyncpa [#allocation3], 1 }
  0x90   :  { %684 = vsyncpa [#allocation4], 1 }

</bundles_post_ra>
